<compile_context>
chip_gen: v7x
topology: tpu7x:2x2x1
jax: 0.10.0
libtpu: 0.0.40
codegen_flags: <defaults>
</compile_context>

<pallas_src>
import functools

import jax
import jax.numpy as jnp
from jax.experimental import pallas as pl
from jax.experimental.pallas import tpu as pltpu

D = 128       # feature / lane width (inDim, hidDim, outDim, mlp hidden <= 128)
NT = 16       # node dim padded to one bf16 sublane tile
GT = 16       # graph dim padded to one bf16 sublane tile
E_PAD = 128   # edge list padded to one lane width


# ----------------------------------------------------------------------------
# Pallas kernel: fused GCN x2 + mean-pool + MLP (single invocation, all VMEM)
# ----------------------------------------------------------------------------
def gnn_kernel(tgt_ref, src_ref, batch_ref, x_ref, w_ref, b_ref, out_ref):
    f32 = jnp.float32

    # ---- adjacency (with self-loops) from the edge list, in-kernel -----------
    # t_oh [i, e] = 1 iff edge e targets node i          (NT, E_PAD)
    # s_ohT[e, j] = 1 iff edge e originates at node j    (E_PAD, NT)
    node_i = jax.lax.broadcasted_iota(jnp.int32, (NT, E_PAD), 0)
    node_j = jax.lax.broadcasted_iota(jnp.int32, (E_PAD, NT), 1)
    t_oh = jnp.where(tgt_ref[...] == node_i, 1.0, 0.0)
    s_ohT = jnp.where(src_ref[...] == node_j, 1.0, 0.0)
    adj = jnp.dot(t_oh, s_ohT, preferred_element_type=f32)          # (NT, NT) edge counts
    eye = jnp.where(jax.lax.broadcasted_iota(jnp.int32, (NT, NT), 0)
                    == jax.lax.broadcasted_iota(jnp.int32, (NT, NT), 1), 1.0, 0.0)
    adj = adj + eye                                                  # add self-loops

    # symmetric normalization, factored: A_norm @ v == dinv * (adj @ (dinv * v))
    deg = jnp.sum(adj, axis=1, keepdims=True)                        # (NT, 1)
    dinv = jnp.where(deg > 0.0, jax.lax.rsqrt(deg), 0.0)

    # ---- mean-pool one-hot from the batch vector ------------------------------
    g_iota = jax.lax.broadcasted_iota(jnp.int32, (GT, NT), 0)
    onehot = jnp.where(batch_ref[...] == g_iota, 1.0, 0.0)          # (GT, NT)
    counts = jnp.sum(onehot, axis=1, keepdims=True)                  # (GT, 1)

    # ---- operands -------------------------------------------------------------
    x = x_ref[...]                                                   # (NT, D) bf16
    w1 = w_ref[0 * D:1 * D, :]
    w2 = w_ref[1 * D:2 * D, :]
    w3 = w_ref[2 * D:3 * D, :]
    w4 = w_ref[3 * D:4 * D, :]
    b1 = b_ref[0:1, :]
    b2 = b_ref[1:2, :]
    b3 = b_ref[2:3, :]
    b4 = b_ref[3:4, :]

    bf = lambda t: t.astype(jnp.bfloat16)   # bf16 MXU operands, f32 accumulation

    # ---- GCN layer 1: relu(A_norm @ (X @ W1) + b1) ----------------------------
    xw = jnp.dot(x, w1, preferred_element_type=f32)                  # (NT, D)
    h = dinv * jnp.dot(adj, dinv * xw, preferred_element_type=f32) + b1
    h = jnp.maximum(h, 0.0)

    # ---- GCN layer 2: A_norm @ (H @ W2) + b2 ----------------------------------
    hw = jnp.dot(bf(h), w2, preferred_element_type=f32)
    z = dinv * jnp.dot(adj, dinv * hw, preferred_element_type=f32) + b2

    # ---- global_mean_pool: (onehot @ Z) / counts ------------------------------
    pooled = jnp.dot(onehot, z, preferred_element_type=f32) / jnp.maximum(counts, 1.0)

    # ---- MLP: Linear(out,16) -> ReLU -> Linear(16,1), lane-padded -------------
    m = jnp.maximum(jnp.dot(bf(pooled), w3, preferred_element_type=f32) + b3, 0.0)
    out_ref[...] = jnp.dot(bf(m), w4, preferred_element_type=f32) + b4


# ----------------------------------------------------------------------------
# One-time packing (static weights / static graph topology) — outside the
# per-call jit path, so no per-forward pad/cast/concat glue.
# ----------------------------------------------------------------------------
def pack_params(params):
    w1, b1, w2, b2, w3, b3, w4, b4 = params

    def padw(w):
        return jnp.pad(w.astype(jnp.float32),
                       ((0, D - w.shape[0]), (0, D - w.shape[1])))

    def padb(b):
        return jnp.pad(b.astype(jnp.float32), (0, D - b.shape[0]))

    w_slab = jnp.concatenate([padw(w1), padw(w2), padw(w3), padw(w4)],
                             axis=0).astype(jnp.bfloat16)            # (4*D, D) bf16
    b_slab = jnp.stack([padb(b1), padb(b2), padb(b3), padb(b4)]
                       + [jnp.zeros((D,), jnp.float32)] * 4, axis=0)  # (8, D) f32
    return w_slab, b_slab


def pack_graph(edge_index, batch, num_nodes):
    e = edge_index.shape[1]
    assert e <= E_PAD and num_nodes <= NT, "graph too large for single-tile kernel"
    src = edge_index[0].astype(jnp.int32)
    tgt = edge_index[1].astype(jnp.int32)
    tgt_row = jnp.full((1, E_PAD), -1, jnp.int32).at[0, :e].set(tgt)     # (1, E_PAD)
    src_col = jnp.full((E_PAD, 1), -1, jnp.int32).at[:e, 0].set(src)     # (E_PAD, 1)
    batch_row = jnp.full((1, NT), -1, jnp.int32).at[0, :num_nodes].set(
        batch.astype(jnp.int32))                                         # (1, NT)
    return tgt_row, src_col, batch_row


# ----------------------------------------------------------------------------
# Forward wrapper: one tiny pad for x + one pallas_call
# ----------------------------------------------------------------------------
def graph_nn_forward(x, tgt_row, src_col, batch_row, w_slab, b_slab, *, num_graphs):
    n, in_dim = x.shape
    assert n <= NT and in_dim <= D and num_graphs <= GT, (
        "fused single-tile kernel assumes <=16 nodes/graphs and feature dims <=128; "
        "larger sizes need a row-tiled grid over the adjacency")

    x_slab = jnp.pad(x.astype(jnp.float32),
                     ((0, NT - n), (0, D - in_dim))).astype(jnp.bfloat16)  # (NT, D)

    flops = 2 * (NT * E_PAD * NT          # adjacency one-hot matmul
                 + 2 * NT * D * D         # X@W1, H@W2
                 + 2 * NT * NT * D        # two A_norm propagations
                 + GT * NT * D            # pooling
                 + 2 * GT * D * D)        # MLP
    bytes_accessed = (2 * E_PAD * 4 + NT * 4          # int edge/batch arrays
                      + NT * D * 2                    # x slab (bf16)
                      + 4 * D * D * 2                 # weight slab (bf16)
                      + 8 * D * 4                     # bias slab (f32)
                      + GT * D * 4)                   # output (f32)
    cost = pl.CostEstimate(flops=flops, transcendentals=NT + GT * D,
                           bytes_accessed=bytes_accessed)

    vmem = pl.BlockSpec(memory_space=pltpu.MemorySpace.VMEM)
    out = pl.pallas_call(
        gnn_kernel,
        in_specs=[vmem] * 6,
        out_specs=vmem,
        out_shape=jax.ShapeDtypeStruct((GT, D), jnp.float32),
        cost_estimate=cost,
    )(tgt_row, src_col, batch_row, x_slab, w_slab, b_slab)

    return out[:num_graphs, 0]               # matches .view(-1)


# ----------------------------------------------------------------------------
# Pure-JAX references (sanity checks)
# ----------------------------------------------------------------------------
def graph_nn_reference(x, edge_index, batch, params, num_graphs, mimic_kernel=False):
    """mimic_kernel=True rounds exactly the operands the Pallas kernel rounds to
    bf16 (x, weights, matmul LHS of the weight dots); False is plain-f32 module
    semantics."""
    n = x.shape[0]
    src, tgt = edge_index[0], edge_index[1]
    adj = jnp.zeros((n, n), jnp.float32).at[tgt, src].add(1.0) + jnp.eye(n, dtype=jnp.float32)
    deg = jnp.sum(adj, axis=1)
    dinv = jnp.where(deg > 0, jax.lax.rsqrt(deg), 0.0)

    onehot = (batch[None, :] == jnp.arange(num_graphs)[:, None]).astype(jnp.float32)
    counts = jnp.sum(onehot, axis=1, keepdims=True)

    hi = jax.lax.Precision.HIGHEST
    if mimic_kernel:
        def wdot(a, b):
            return jnp.dot(a.astype(jnp.bfloat16).astype(jnp.float32),
                           b.astype(jnp.bfloat16).astype(jnp.float32), precision=hi)
    else:
        def wdot(a, b):
            return jnp.dot(a, b, precision=hi)

    def propagate(t):     # A_norm @ t, factored like the kernel (all f32)
        return dinv[:, None] * jnp.dot(adj, dinv[:, None] * t, precision=hi)

    w1, b1, w2, b2, w3, b3, w4, b4 = params
    x = x.astype(jnp.float32)
    h = jnp.maximum(propagate(wdot(x, w1)) + b1, 0.0)
    z = propagate(wdot(h, w2)) + b2
    pooled = jnp.dot(onehot, z, precision=hi) / jnp.maximum(counts, 1.0)
    m = jnp.maximum(wdot(pooled, w3) + b3, 0.0)
    return (wdot(m, w4) + b4).reshape(-1)


# ----------------------------------------------------------------------------
if __name__ == "__main__":
    # Small shapes consistent with the module:
    #   N=8 nodes, inputDim=4, hiddenDim=32, outputDim=8, 2 graphs in the batch
    N, IN_DIM, HID_DIM, OUT_DIM, NUM_GRAPHS = 8, 4, 32, 8, 2

    key = jax.random.PRNGKey(0)
    k_x, k_w1, k_w2, k_w3, k_b3, k_w4, k_b4 = jax.random.split(key, 7)

    # Node features
    x = jax.random.normal(k_x, (N, IN_DIM), dtype=jnp.float32)

    # Undirected edge list (both directions), two disjoint 4-node chain graphs
    src = jnp.array([0, 1, 1, 2, 2, 3, 4, 5, 5, 6, 6, 7], dtype=jnp.int32)
    tgt = jnp.array([1, 0, 2, 1, 3, 2, 5, 4, 6, 5, 7, 6], dtype=jnp.int32)
    edge_index = jnp.stack([src, tgt], axis=0)

    # Graph membership of each node
    batch = jnp.array([0, 0, 0, 0, 1, 1, 1, 1], dtype=jnp.int32)

    # Deterministic parameter init (glorot-ish weights; PyG GCN biases are zeros)
    def glorot(k, fan_in, fan_out):
        scale = jnp.sqrt(6.0 / (fan_in + fan_out))
        return jax.random.uniform(k, (fan_in, fan_out), jnp.float32, -scale, scale)

    w1 = glorot(k_w1, IN_DIM, HID_DIM)
    b1 = jnp.zeros((HID_DIM,), jnp.float32)
    w2 = glorot(k_w2, HID_DIM, OUT_DIM)
    b2 = jnp.zeros((OUT_DIM,), jnp.float32)
    w3 = glorot(k_w3, OUT_DIM, 16)
    b3 = jax.random.uniform(k_b3, (16,), jnp.float32, -0.1, 0.1)
    w4 = glorot(k_w4, 16, 1)
    b4 = jax.random.uniform(k_b4, (1,), jnp.float32, -0.1, 0.1)
    params = (w1, b1, w2, b2, w3, b3, w4, b4)

    # One-time packing of static operands (outside the per-call path)
    w_slab, b_slab = pack_params(params)
    tgt_row, src_col, batch_row = pack_graph(edge_index, batch, N)

    fwd = jax.jit(functools.partial(graph_nn_forward, num_graphs=NUM_GRAPHS))
    out = jax.block_until_ready(fwd(x, tgt_row, src_col, batch_row, w_slab, b_slab))

    ref_mimic = graph_nn_reference(x, edge_index, batch, params, NUM_GRAPHS,
                                   mimic_kernel=True)    # bit-faithful bf16 path
    ref_f32 = graph_nn_reference(x, edge_index, batch, params, NUM_GRAPHS,
                                 mimic_kernel=False)     # module f32 semantics

    assert out.shape == (NUM_GRAPHS,)
    assert jnp.allclose(out, ref_mimic, atol=1e-3, rtol=1e-3), (out, ref_mimic)
    assert jnp.allclose(out, ref_f32, atol=5e-2, rtol=5e-2), (out, ref_f32)

    print("KERNEL_OK")
</pallas_src>

<mosaic_0001>
module attributes {stable_mosaic.version = 11 : i64} {
  func.func @gnn_kernel(%arg0: memref<1x128xi32, #tpu.memory_space<vmem>>, %arg1: memref<128x1xi32, #tpu.memory_space<vmem>>, %arg2: memref<1x16xi32, #tpu.memory_space<vmem>>, %arg3: memref<16x128xbf16, #tpu.memory_space<vmem>>, %arg4: memref<512x128xbf16, #tpu.memory_space<vmem>>, %arg5: memref<8x128xf32, #tpu.memory_space<vmem>>, %arg6: memref<16x128xf32, #tpu.memory_space<vmem>>) attributes {dimension_semantics = [], scalar_prefetch = 0 : i64, scratch_operands = 0 : i64, tpu.core_type = #tpu.core_type<tc>} {
    %0 = tpu.iota {dimensions = array<i32: 0>} : vector<16x128xi32>
    %1 = tpu.iota {dimensions = array<i32: 1>} : vector<128x16xi32>
    %c0 = arith.constant 0 : index
    %c0_0 = arith.constant 0 : index
    %2 = vector.load %arg0[%c0, %c0_0] : memref<1x128xi32, #tpu.memory_space<vmem>>, vector<1x128xi32>
    %3 = vector.broadcast %2 : vector<1x128xi32> to vector<16x128xi32>
    %4 = arith.cmpi eq, %3, %0 : vector<16x128xi32>
    %cst = arith.constant 1.000000e+00 : f32
    %cst_1 = arith.constant 0.000000e+00 : f32
    %5 = vector.broadcast %cst : f32 to vector<16x128xf32>
    %6 = vector.broadcast %cst_1 : f32 to vector<16x128xf32>
    %7 = arith.select %4, %5, %6 : vector<16x128xi1>, vector<16x128xf32>
    %c0_2 = arith.constant 0 : index
    %c0_3 = arith.constant 0 : index
    %8 = vector.load %arg1[%c0_2, %c0_3] : memref<128x1xi32, #tpu.memory_space<vmem>>, vector<128x1xi32>
    %9 = vector.broadcast %8 : vector<128x1xi32> to vector<128x16xi32>
    %10 = arith.cmpi eq, %9, %1 : vector<128x16xi32>
    %cst_4 = arith.constant 1.000000e+00 : f32
    %cst_5 = arith.constant 0.000000e+00 : f32
    %11 = vector.broadcast %cst_4 : f32 to vector<128x16xf32>
    %12 = vector.broadcast %cst_5 : f32 to vector<128x16xf32>
    %13 = arith.select %10, %11, %12 : vector<128x16xi1>, vector<128x16xf32>
    %cst_6 = arith.constant dense<0.000000e+00> : vector<16x16xf32>
    %14 = tpu.matmul %7, %13, %cst_6 {dimension_numbers = #tpu.dot_dimension_numbers<[1], [0], [0], [1], [0, 0, 1, 1], [], []>} : vector<16x128xf32>, vector<128x16xf32>, vector<16x16xf32> -> vector<16x16xf32>
    %15 = tpu.iota {dimensions = array<i32: 0>} : vector<16x16xi32>
    %16 = tpu.iota {dimensions = array<i32: 1>} : vector<16x16xi32>
    %17 = arith.cmpi eq, %15, %16 : vector<16x16xi32>
    %cst_7 = arith.constant 1.000000e+00 : f32
    %cst_8 = arith.constant 0.000000e+00 : f32
    %18 = vector.broadcast %cst_7 : f32 to vector<16x16xf32>
    %19 = vector.broadcast %cst_8 : f32 to vector<16x16xf32>
    %20 = arith.select %17, %18, %19 : vector<16x16xi1>, vector<16x16xf32>
    %21 = arith.addf %14, %20 : vector<16x16xf32>
    %cst_9 = arith.constant dense<0.000000e+00> : vector<16xf32>
    %22 = vector.multi_reduction <add>, %21, %cst_9 [1] : vector<16x16xf32> to vector<16xf32>
    %23 = vector.shape_cast %22 : vector<16xf32> to vector<16x1xf32>
    %cst_10 = arith.constant 0.000000e+00 : f32
    %24 = vector.broadcast %cst_10 : f32 to vector<16x1xf32>
    %25 = arith.cmpf ogt, %23, %24 : vector<16x1xf32>
    %26 = math.rsqrt %23 : vector<16x1xf32>
    %cst_11 = arith.constant 0.000000e+00 : f32
    %27 = vector.broadcast %cst_11 : f32 to vector<16x1xf32>
    %28 = arith.select %25, %26, %27 : vector<16x1xi1>, vector<16x1xf32>
    %29 = tpu.iota {dimensions = array<i32: 0>} : vector<16x16xi32>
    %c0_12 = arith.constant 0 : index
    %c0_13 = arith.constant 0 : index
    %30 = vector.load %arg2[%c0_12, %c0_13] : memref<1x16xi32, #tpu.memory_space<vmem>>, vector<1x16xi32>
    %31 = vector.broadcast %30 : vector<1x16xi32> to vector<16x16xi32>
    %32 = arith.cmpi eq, %31, %29 : vector<16x16xi32>
    %cst_14 = arith.constant 1.000000e+00 : f32
    %cst_15 = arith.constant 0.000000e+00 : f32
    %33 = vector.broadcast %cst_14 : f32 to vector<16x16xf32>
    %34 = vector.broadcast %cst_15 : f32 to vector<16x16xf32>
    %35 = arith.select %32, %33, %34 : vector<16x16xi1>, vector<16x16xf32>
    %cst_16 = arith.constant dense<0.000000e+00> : vector<16xf32>
    %36 = vector.multi_reduction <add>, %35, %cst_16 [1] : vector<16x16xf32> to vector<16xf32>
    %37 = vector.shape_cast %36 : vector<16xf32> to vector<16x1xf32>
    %c0_17 = arith.constant 0 : index
    %c0_18 = arith.constant 0 : index
    %38 = vector.load %arg3[%c0_17, %c0_18] : memref<16x128xbf16, #tpu.memory_space<vmem>>, vector<16x128xbf16>
    %c0_19 = arith.constant 0 : index
    %c0_20 = arith.constant 0 : index
    %39 = vector.load %arg4[%c0_19, %c0_20] : memref<512x128xbf16, #tpu.memory_space<vmem>>, vector<128x128xbf16>
    %c128 = arith.constant 128 : index
    %c0_21 = arith.constant 0 : index
    %40 = vector.load %arg4[%c128, %c0_21] : memref<512x128xbf16, #tpu.memory_space<vmem>>, vector<128x128xbf16>
    %c256 = arith.constant 256 : index
    %c0_22 = arith.constant 0 : index
    %41 = vector.load %arg4[%c256, %c0_22] : memref<512x128xbf16, #tpu.memory_space<vmem>>, vector<128x128xbf16>
    %c384 = arith.constant 384 : index
    %c0_23 = arith.constant 0 : index
    %42 = vector.load %arg4[%c384, %c0_23] : memref<512x128xbf16, #tpu.memory_space<vmem>>, vector<128x128xbf16>
    %c0_24 = arith.constant 0 : index
    %c0_25 = arith.constant 0 : index
    %43 = vector.load %arg5[%c0_24, %c0_25] : memref<8x128xf32, #tpu.memory_space<vmem>>, vector<1x128xf32>
    %c1 = arith.constant 1 : index
    %c0_26 = arith.constant 0 : index
    %44 = vector.load %arg5[%c1, %c0_26] : memref<8x128xf32, #tpu.memory_space<vmem>>, vector<1x128xf32>
    %c2 = arith.constant 2 : index
    %c0_27 = arith.constant 0 : index
    %45 = vector.load %arg5[%c2, %c0_27] : memref<8x128xf32, #tpu.memory_space<vmem>>, vector<1x128xf32>
    %c3 = arith.constant 3 : index
    %c0_28 = arith.constant 0 : index
    %46 = vector.load %arg5[%c3, %c0_28] : memref<8x128xf32, #tpu.memory_space<vmem>>, vector<1x128xf32>
    %cst_29 = arith.constant dense<0.000000e+00> : vector<16x128xf32>
    %47 = tpu.matmul %38, %39, %cst_29 {dimension_numbers = #tpu.dot_dimension_numbers<[1], [0], [0], [1], [0, 0, 1, 1], [], []>} : vector<16x128xbf16>, vector<128x128xbf16>, vector<16x128xf32> -> vector<16x128xf32>
    %48 = vector.broadcast %28 : vector<16x1xf32> to vector<16x128xf32>
    %49 = arith.mulf %48, %47 : vector<16x128xf32>
    %cst_30 = arith.constant dense<0.000000e+00> : vector<16x128xf32>
    %50 = tpu.matmul %21, %49, %cst_30 {dimension_numbers = #tpu.dot_dimension_numbers<[1], [0], [0], [1], [0, 0, 1, 1], [], []>} : vector<16x16xf32>, vector<16x128xf32>, vector<16x128xf32> -> vector<16x128xf32>
    %51 = vector.broadcast %28 : vector<16x1xf32> to vector<16x128xf32>
    %52 = arith.mulf %51, %50 : vector<16x128xf32>
    %53 = vector.broadcast %43 : vector<1x128xf32> to vector<16x128xf32>
    %54 = arith.addf %52, %53 : vector<16x128xf32>
    %cst_31 = arith.constant 0.000000e+00 : f32
    %55 = vector.broadcast %cst_31 : f32 to vector<16x128xf32>
    %56 = arith.maximumf %54, %55 : vector<16x128xf32>
    %57 = arith.truncf %56 : vector<16x128xf32> to vector<16x128xbf16>
    %cst_32 = arith.constant dense<0.000000e+00> : vector<16x128xf32>
    %58 = tpu.matmul %57, %40, %cst_32 {dimension_numbers = #tpu.dot_dimension_numbers<[1], [0], [0], [1], [0, 0, 1, 1], [], []>} : vector<16x128xbf16>, vector<128x128xbf16>, vector<16x128xf32> -> vector<16x128xf32>
    %59 = vector.broadcast %28 : vector<16x1xf32> to vector<16x128xf32>
    %60 = arith.mulf %59, %58 : vector<16x128xf32>
    %cst_33 = arith.constant dense<0.000000e+00> : vector<16x128xf32>
    %61 = tpu.matmul %21, %60, %cst_33 {dimension_numbers = #tpu.dot_dimension_numbers<[1], [0], [0], [1], [0, 0, 1, 1], [], []>} : vector<16x16xf32>, vector<16x128xf32>, vector<16x128xf32> -> vector<16x128xf32>
    %62 = vector.broadcast %28 : vector<16x1xf32> to vector<16x128xf32>
    %63 = arith.mulf %62, %61 : vector<16x128xf32>
    %64 = vector.broadcast %44 : vector<1x128xf32> to vector<16x128xf32>
    %65 = arith.addf %63, %64 : vector<16x128xf32>
    %cst_34 = arith.constant dense<0.000000e+00> : vector<16x128xf32>
    %66 = tpu.matmul %35, %65, %cst_34 {dimension_numbers = #tpu.dot_dimension_numbers<[1], [0], [0], [1], [0, 0, 1, 1], [], []>} : vector<16x16xf32>, vector<16x128xf32>, vector<16x128xf32> -> vector<16x128xf32>
    %cst_35 = arith.constant 1.000000e+00 : f32
    %67 = vector.broadcast %cst_35 : f32 to vector<16x1xf32>
    %68 = arith.maximumf %37, %67 : vector<16x1xf32>
    %69 = vector.broadcast %68 : vector<16x1xf32> to vector<16x128xf32>
    %70 = arith.divf %66, %69 : vector<16x128xf32>
    %71 = arith.truncf %70 : vector<16x128xf32> to vector<16x128xbf16>
    %cst_36 = arith.constant dense<0.000000e+00> : vector<16x128xf32>
    %72 = tpu.matmul %71, %41, %cst_36 {dimension_numbers = #tpu.dot_dimension_numbers<[1], [0], [0], [1], [0, 0, 1, 1], [], []>} : vector<16x128xbf16>, vector<128x128xbf16>, vector<16x128xf32> -> vector<16x128xf32>
    %73 = vector.broadcast %45 : vector<1x128xf32> to vector<16x128xf32>
    %74 = arith.addf %72, %73 : vector<16x128xf32>
    %cst_37 = arith.constant 0.000000e+00 : f32
    %75 = vector.broadcast %cst_37 : f32 to vector<16x128xf32>
    %76 = arith.maximumf %74, %75 : vector<16x128xf32>
    %77 = arith.truncf %76 : vector<16x128xf32> to vector<16x128xbf16>
    %cst_38 = arith.constant dense<0.000000e+00> : vector<16x128xf32>
    %78 = tpu.matmul %77, %42, %cst_38 {dimension_numbers = #tpu.dot_dimension_numbers<[1], [0], [0], [1], [0, 0, 1, 1], [], []>} : vector<16x128xbf16>, vector<128x128xbf16>, vector<16x128xf32> -> vector<16x128xf32>
    %79 = vector.broadcast %46 : vector<1x128xf32> to vector<16x128xf32>
    %80 = arith.addf %78, %79 : vector<16x128xf32>
    %c0_39 = arith.constant 0 : index
    %c0_40 = arith.constant 0 : index
    %81 = vector.load %arg6[%c0_39, %c0_40] : memref<16x128xf32, #tpu.memory_space<vmem>>, vector<16x128xf32>
    tpu.vector_store %arg6[%c0_39, %c0_40], %80 {strides = array<i32>} : memref<16x128xf32, #tpu.memory_space<vmem>>, vector<16x128xf32>,
    return
  }
}

</mosaic_0001>

<bundles_post_ra>
// kernel: graph_nn_forward.1
= control target key start
LH: loop header
LB: loop body
LE: loop exit
PB: predicated region body
PF: predicated region fallthrough
CT: control target
= control target key end

     0   :  { %11 = vsyncpa [#allocation3], 0  ;;  %s1356_s21 = smov [#allocation2]   ;;  %s1582_s0 = inlined_call_operand.vmem [shape: s32[1,128], index: 0, kind: input, shape index: {}]   ;;  %s1583_s1 = inlined_call_operand.vmem [shape: s32[128,1], index: 1, kind: input, shape index: {}]   ;;  %s1584_s2 = inlined_call_operand.vmem [shape: s32[1,16], index: 2, kind: input, shape index: {}]   ;;  %s1585_s3 = inlined_call_operand.vmem [shape: bf16[16,128], index: 3, kind: input, shape index: {}]   ;;  %s1586_s4 = inlined_call_operand.hbm [shape: bf16[512,128], index: 4, kind: input, shape index: {}]   ;;  %s1587_s5 = inlined_call_operand.vmem [shape: f32[8,128], index: 5, kind: input, shape index: {}]   ;;  %s1588_s6 = inlined_call_operand.vmem [shape: f32[16,128], index: 6, kind: output, shape index: {}]  }
   0x1   :  { %s25_s22 = sshll.u32 %s1356_s21, 4  ;;  %s1332_s25 = scalar_lea.hbm %s1586_s4, 4096  ;;  %s26_s22 = int_to_ptr.vmem [resolvable:$true] %s25_s22 }
   0x2   :  { %p1333_p0 = scmp.ne.s32.totalorder %s1586_s4, %s1332_s25  ;;  %p1336_p1 = scmp.lt.u32.totalorder %s1332_s25, %s1586_s4 }
   0x4   :  { %p1338_p2 = pnand %p1336_p1, %p1333_p0 }
   0x6   :  { %1341 = shalt.err (!%p1338_p2)
}
   0x7   :  { %s1342_s30 = scalar_lea.vmem %s26_s22, 4096  ;;  %p1347_p4 = scmp.lt.s32.totalorder %s26_s22, %s26_s22 }
   0x8   :  { %p1343_p3 = scmp.ne.s32.totalorder %s26_s22, %s1342_s30  ;;  %p1348_p5 = scmp.lt.s32.totalorder %s1342_s30, %s1342_s30 }
   0xa   :  { %p1349_p6 = por %p1348_p5, %p1347_p4 }
   0xc   :  { %p1350_p7 = pnand %p1349_p6, %p1343_p3 }
   0xe   :  { %1353 = shalt.err (!%p1350_p7)
}
   0xf   :  { %s1357_s7 = smov 64   ;;  %s1358_s8 = smov 4  }
  0x10   :  { %31 = dma.hbm_to_vmem [thread:$0]  %s1586_s4, 4096, %s26_s22, [#allocation3], %s1357_s7, %s1357_s7, %s1358_s8  }
  0x11   :  { %1354 = dma.done.wait [#allocation3], 4096  }
  0x12   :  { %1355 = vsyncadd [#allocation3], 4294963200  ;;  %v1359_v0 = vmov 0   ;;  %v54_v1 = vld [vmem:[%s1583_s1 + $0x10] sm:$0xff]  ;;  %v52_v2 = vld [vmem:[%s1583_s1] sm:$0xff]  ;;  %v38_v17 = vlaneseq  ;;  %v1360_v20 = vmov 1.0  }
  0x13   :  { %1290 = vset.pattern.permute.xlu1 %v1359_v0  ;;  %1289 = vset.pattern.permute.xlu0 %v1359_v0  ;;  %v55_v3 = vld [vmem:[%s1583_s1 + $0x18] sm:$0xff]  ;;  %v53_v4 = vld [vmem:[%s1583_s1 + $0x8] sm:$0xff]  ;;  %v56_v6 = vld [vmem:[%s1583_s1 + $0x20] sm:$0xff]  ;;  %v1361_v22 = vmov 0.0   ;;  %vm1362_vm1 = vmmov 0  }
  0x14   :  { %75 = vperm.xlu1 %1290, %v54_v1   ;;  %69 = vperm.xlu0 %1289, %v52_v2   ;;  %v57_v5 = vld [vmem:[%s1583_s1 + $0x28] sm:$0xff]  ;;  %v59_v7 = vld [vmem:[%s1583_s1 + $0x38] sm:$0xff]  ;;  %v58_v8 = vld [vmem:[%s1583_s1 + $0x30] sm:$0xff]  ;;  %v1459_v18 = vshrl.u32 %v38_v17, 7  ;;  %v1485_v33 = vand.u32 127, %v38_v17 }
  0x15   :  { %v61_v9 = vld [vmem:[%s1583_s1 + $0x48] sm:$0xff]  ;;  %v60_v10 = vld [vmem:[%s1583_s1 + $0x40] sm:$0xff]  ;;  %v63_v11 = vld [vmem:[%s1583_s1 + $0x58] sm:$0xff]  ;;  %1136 = vmatprep.subr.bf16.mxu1 %v1361_v22  ;;  %1152 = vmatprep.mubr.msk.bf16.mxu1 %vm1362_vm1, %v1361_v22  ;;  %v1363_v36 = vmov 1.0|1.0  }
  0x16   :  { %v62_v12 = vld [vmem:[%s1583_s1 + $0x50] sm:$0xff]  ;;  %v65_v13 = vld [vmem:[%s1583_s1 + $0x68] sm:$0xff]  ;;  %v64_v14 = vld [vmem:[%s1583_s1 + $0x60] sm:$0xff]  ;;  %v1504_v49 = vadd.s32 8, %v1459_v18 }
  0x17   :  { %v67_v15 = vld [vmem:[%s1583_s1 + $0x78] sm:$0xff]  ;;  %v66_v16 = vld [vmem:[%s1583_s1 + $0x70] sm:$0xff]  ;;  %v1464_v19 = vld [vmem:[%s1582_s0] ss:$0 sm:$0xff] }
  0x18   :  { %78 = vperm.xlu1 %1290, %v55_v3   ;;  %72 = vperm.xlu0 %1289, %v53_v4   ;;  %vm48_vm0 = vcmp.eq.s32.totalorder %v1464_v19, %v1459_v18  ;;  %v1291_v21 = vld [vmem:[#allocation2] sm:$0xff]   ;;  %v1292_v23 = vld [vmem:[#allocation2 + $0x8] sm:$0xff]   ;;  %v1293_v24 = vld [vmem:[#allocation2 + $0x10] sm:$0xff]  }
  0x19   :  { %1133 = vmatprep.mubr.msk.f32.mxu0 %vm48_vm0, %v1360_v20  ;;  %1137 = vmatpush3.bf16.msra.mxu1 %v1291_v21  ;;  %v1294_v25 = vld [vmem:[#allocation2 + $0x18] sm:$0xff]   ;;  %v1295_v26 = vld [vmem:[#allocation2 + $0x20] sm:$0xff]   ;;  %v1296_v27 = vld [vmem:[#allocation2 + $0x28] sm:$0xff]  }
  0x1a   :  { %1138 = vmatprep.subr.bf16.mxu1 %v1361_v22  ;;  %v1297_v28 = vld [vmem:[#allocation2 + $0x30] sm:$0xff]   ;;  %v1298_v29 = vld [vmem:[#allocation2 + $0x38] sm:$0xff]   ;;  %v1299_v30 = vld [vmem:[%s1585_s3] sm:$0xff]  }
  0x1b   :  { %v1300_v62 = vld [vmem:[#allocation2 + $0x40] sm:$0xff]   ;;  %v1301_v63 = vld [vmem:[#allocation2 + $0x48] sm:$0xff]   ;;  %v1302_v0 = vld [vmem:[#allocation2 + $0x50] sm:$0xff]  }
  0x1c   :  { %84 = vperm.xlu1 %1290, %v57_v5   ;;  %81 = vperm.xlu0 %1289, %v56_v6   ;;  %v1303_v1 = vld [vmem:[#allocation2 + $0x58] sm:$0xff]   ;;  %v1304_v2 = vld [vmem:[#allocation2 + $0x60] sm:$0xff]   ;;  %v1305_v3 = vld [vmem:[#allocation2 + $0x68] sm:$0xff]  }
  0x1d   :  { %1139 = vmatpush3.bf16.msra.mxu1 %v1292_v23 }
  0x1e   :  { %1140 = vmatprep.subr.bf16.mxu1 %v1361_v22 }
  0x20   :  { %90 = vperm.xlu1 %1290, %v59_v7   ;;  %87 = vperm.xlu0 %1289, %v58_v8  }
  0x21   :  { %1141 = vmatpush3.bf16.msra.mxu1 %v1293_v24 }
  0x22   :  { %1142 = vmatprep.subr.bf16.mxu1 %v1361_v22 }
  0x24   :  { %96 = vperm.xlu1 %1290, %v61_v9   ;;  %93 = vperm.xlu0 %1289, %v60_v10  }
  0x25   :  { %1143 = vmatpush3.bf16.msra.mxu1 %v1294_v25 }
  0x26   :  { %1144 = vmatprep.subr.bf16.mxu1 %v1361_v22 }
  0x28   :  { %102 = vperm.xlu1 %1290, %v63_v11   ;;  %99 = vperm.xlu0 %1289, %v62_v12  }
  0x29   :  { %1145 = vmatpush3.bf16.msra.mxu1 %v1295_v26 }
  0x2a   :  { %1146 = vmatprep.subr.bf16.mxu1 %v1361_v22 }
  0x2c   :  { %108 = vperm.xlu1 %1290, %v65_v13   ;;  %105 = vperm.xlu0 %1289, %v64_v14   ;;  %v1306_v13 = vld [vmem:[#allocation2 + $0x70] sm:$0xff]   ;;  %v1307_v14 = vld [vmem:[#allocation2 + $0x78] sm:$0xff]  }
  0x2d   :  { %1147 = vmatpush3.bf16.msra.mxu1 %v1296_v27 }
  0x2e   :  { %1148 = vmatprep.subr.bf16.mxu1 %v1361_v22 }
  0x30   :  { %114 = vperm.xlu1 %1290, %v67_v15   ;;  %111 = vperm.xlu0 %1289, %v66_v16   ;;  %v1003_v15 = vld [vmem:[%s1587_s5] ss:$0 sm:$0xff] }
  0x31   :  { %1149 = vmatpush3.bf16.msra.mxu1 %v1297_v28 }
  0x32   :  { %1150 = vmatprep.subr.bf16.mxu1 %v1361_v22 }
  0x35   :  { %1151 = vmatpush3.bf16.msra.mxu1 %v1298_v29 }
  0x36   :  { %1163 = vmatprep.subr.bf16.mxu1 %v1361_v22 }
  0x38   :  { %1153 = vmatmul.mubr.bf16.vlgmr.msra.gmra.mrb[0].mxu1 %v1299_v30 }
  0x39   :  { %1179 = vmatprep.mubr.msk.bf16.mxu1 %vm1362_vm1, %v1361_v22  ;;  %1164 = vmatpush3.bf16.msra.mxu1 %v1300_v62 }
  0x3a   :  { %1165 = vmatprep.subr.bf16.mxu1 %v1361_v22 }
  0x3d   :  { %1166 = vmatpush3.bf16.msra.mxu1 %v1301_v63 }
  0x3e   :  { %1167 = vmatprep.subr.bf16.mxu1 %v1361_v22 }
  0x41   :  { %1168 = vmatpush3.bf16.msra.mxu1 %v1302_v0 }
  0x42   :  { %1169 = vmatprep.subr.bf16.mxu1 %v1361_v22 }
  0x45   :  { %1170 = vmatpush3.bf16.msra.mxu1 %v1303_v1 }
  0x46   :  { %1171 = vmatprep.subr.bf16.mxu1 %v1361_v22 }
  0x49   :  { %1172 = vmatpush3.bf16.msra.mxu1 %v1304_v2 }
  0x4a   :  { %1173 = vmatprep.subr.bf16.mxu1 %v1361_v22 }
  0x4d   :  { %1174 = vmatpush3.bf16.msra.mxu1 %v1305_v3 }
  0x4e   :  { %1175 = vmatprep.subr.bf16.mxu1 %v1361_v22 }
  0x51   :  { %1176 = vmatpush3.bf16.msra.mxu1 %v1306_v13 }
  0x52   :  { %1177 = vmatprep.subr.bf16.mxu1 %v1361_v22 }
  0x55   :  { %1178 = vmatpush3.bf16.msra.mxu1 %v1307_v14 }
  0x56   :  { %1217 = vmatprep.subr.bf16.mxu1 %v1361_v22 }
  0x93   :  { %v76_v31 = vpop.permute.xlu1 %75  ;;  %v70_v32 = vpop.permute.xlu0 %69 }
  0x94   :  { %vm118_vm3 = vcmp.eq.s32.totalorder %v76_v31, %v1485_v33  ;;  %vm116_vm4 = vcmp.eq.s32.totalorder %v70_v32, %v1485_v33 }
  0x97   :  { %v79_v34 = vpop.permute.xlu1 %78  ;;  %v73_v35 = vpop.permute.xlu0 %72 }
  0x98   :  { %vm117_vm2 = vcmp.eq.s32.totalorder %v73_v35, %v1485_v33  ;;  %vm119_vm5 = vcmp.eq.s32.totalorder %v79_v34, %v1485_v33  ;;  %v991_v34 = vld [vmem:[%s1584_s2] ss:$0 sm:$0xff] }
  0x99   :  { %vm1237_vm6 = vmpackc.low %vm117_vm2, %vm116_vm4 }
  0x9a   :  { %1238 = vmatprep.subr.msk.bf16.mxu0 %vm1237_vm6, %v1363_v36  ;;  %vm1241_vm7 = vmpackc.low %vm119_vm5, %vm118_vm3 }
  0x9b   :  { %v85_v37 = vpop.permute.xlu1 %84  ;;  %v82_v38 = vpop.permute.xlu0 %81  ;;  %1240 = vmatpush3.bf16.msk.msra.mxu0 %vm1237_vm6, %v1363_v36 }
  0x9c   :  { %vm121_vm8 = vcmp.eq.s32.totalorder %v85_v37, %v1485_v33  ;;  %vm120_vm9 = vcmp.eq.s32.totalorder %v82_v38, %v1485_v33  ;;  %1242 = vmatprep.subr.msk.bf16.mxu0 %vm1241_vm7, %v1363_v36 }
  0x9d   :  { %vm1245_vm10 = vmpackc.low %vm121_vm8, %vm120_vm9 }
  0x9f   :  { %v91_v39 = vpop.permute.xlu1 %90  ;;  %v88_v40 = vpop.permute.xlu0 %87  ;;  %1244 = vmatpush3.bf16.msk.msra.mxu0 %vm1241_vm7, %v1363_v36 }
  0xa0   :  { %vm123_vm11 = vcmp.eq.s32.totalorder %v91_v39, %v1485_v33  ;;  %vm122_vm12 = vcmp.eq.s32.totalorder %v88_v40, %v1485_v33  ;;  %1246 = vmatprep.subr.msk.bf16.mxu0 %vm1245_vm10, %v1363_v36  ;;  %v1014_v39 = vld [vmem:[%s1587_s5 + $0x1] ss:$0 sm:$0xff] }
  0xa1   :  { %vm1249_vm13 = vmpackc.low %vm123_vm11, %vm122_vm12  ;;  %vm49_vm11 = vcmp.eq.s32.totalorder %v1464_v19, %v1504_v49  ;;  %vm149_vm12 = vcmp.eq.s32.totalorder %v1504_v49, %v1485_v33 }
  0xa2   :  { %v151_v50 = vsel %vm149_vm12, 1.0, %v1361_v22 }
  0xa3   :  { %v97_v41 = vpop.permute.xlu1 %96  ;;  %v94_v42 = vpop.permute.xlu0 %93  ;;  %1248 = vmatpush3.bf16.msk.msra.mxu0 %vm1245_vm10, %v1363_v36 }
  0xa4   :  { %vm125_vm14 = vcmp.eq.s32.totalorder %v97_v41, %v1485_v33  ;;  %vm124_vm15 = vcmp.eq.s32.totalorder %v94_v42, %v1485_v33  ;;  %1250 = vmatprep.subr.msk.bf16.mxu0 %vm1249_vm13, %v1363_v36 }
  0xa5   :  { %vm1253_vm0 = vmpackc.low %vm125_vm14, %vm124_vm15  ;;  %vm227_vm14 = vcmask 130048  }
  0xa7   :  { %v103_v43 = vpop.permute.xlu1 %102  ;;  %v100_v44 = vpop.permute.xlu0 %99  ;;  %1252 = vmatpush3.bf16.msk.msra.mxu0 %vm1249_vm13, %v1363_v36  ;;  %vm148_vm13 = vcmp.eq.s32.totalorder %v1459_v18, %v1485_v33 }
  0xa8   :  { %vm127_vm2 = vcmp.eq.s32.totalorder %v103_v43, %v1485_v33  ;;  %vm126_vm3 = vcmp.eq.s32.totalorder %v100_v44, %v1485_v33  ;;  %1254 = vmatprep.subr.msk.bf16.mxu0 %vm1253_vm0, %v1363_v36  ;;  %v150_v51 = vsel %vm148_vm13, 1.0, %v1361_v22 }
  0xa9   :  { %vm1257_vm4 = vmpackc.low %vm127_vm2, %vm126_vm3  ;;  %vm245_vm2 = vcmp.eq.s32.totalorder %v991_v34, %v1459_v18  ;;  %vm246_vm3 = vcmp.eq.s32.totalorder %v991_v34, %v1504_v49  ;;  %v1311_v49 = vld [vmem:[#allocation2 + $0x98] sm:$0xff]  }
  0xaa   :  { %v247_v35 = vsel %vm245_vm2, 1.0, %v1361_v22  ;;  %v248_v37 = vsel %vm246_vm3, 1.0, %v1361_v22 }
  0xab   :  { %v109_v45 = vpop.permute.xlu1 %108  ;;  %v106_v46 = vpop.permute.xlu0 %105  ;;  %1256 = vmatpush3.bf16.msk.msra.mxu0 %vm1253_vm0, %v1363_v36  ;;  %v252_v38 = vsel %vm227_vm14, %v248_v37, 0.0 }
  0xac   :  { %vm129_vm5 = vcmp.eq.s32.totalorder %v109_v45, %v1485_v33  ;;  %vm128_vm6 = vcmp.eq.s32.totalorder %v106_v46, %v1485_v33  ;;  %1258 = vmatprep.subr.msk.bf16.mxu0 %vm1257_vm4, %v1363_v36  ;;  %v1308_v46 = vld [vmem:[#allocation2 + $0x80] sm:$0xff]  }
  0xad   :  { %vm1261_vm7 = vmpackc.low %vm129_vm5, %vm128_vm6 }
  0xaf   :  { %v115_v47 = vpop.permute.xlu1 %114  ;;  %v112_v48 = vpop.permute.xlu0 %111  ;;  %1260 = vmatpush3.bf16.msk.msra.mxu0 %vm1257_vm4, %v1363_v36 }
  0xb0   :  { %vm131_vm8 = vcmp.eq.s32.totalorder %v115_v47, %v1485_v33  ;;  %vm130_vm9 = vcmp.eq.s32.totalorder %v112_v48, %v1485_v33  ;;  %1262 = vmatprep.subr.msk.bf16.mxu0 %vm1261_vm7, %v1363_v36  ;;  %v1309_v47 = vld [vmem:[#allocation2 + $0x88] sm:$0xff]   ;;  %v1310_v48 = vld [vmem:[#allocation2 + $0x90] sm:$0xff]  }
  0xb1   :  { %vm1265_vm10 = vmpackc.low %vm131_vm8, %vm130_vm9 }
  0xb3   :  { %1264 = vmatpush3.bf16.msk.msra.mxu0 %vm1261_vm7, %v1363_v36 }
  0xb4   :  { %1266 = vmatprep.subr.msk.bf16.mxu0 %vm1265_vm10, %v1363_v36 }
  0xb7   :  { %1268 = vmatpush3.bf16.msk.msra.mxu0 %vm1265_vm10, %v1363_v36  ;;  %v249_v36 = vsel %vm227_vm14, %v247_v35, 0.0 }
  0xba   :  { %1134 = vmatmul.mubr.msk.f32.vlgmr.msra.gmra.mrb[0].mxu0 %vm49_vm11, %v1360_v20 }
 0x10b   :  { %v413_v58 = vpop.f32.mrb[0].mxu1 }
 0x10c   :  { %v1154_v59 = vpop.f32.mrb[1].mxu1 }
 0x10d   :  { %v416_v60 = vpop.f32.mrb[2].mxu1  ;;  %v1321_v59 = vld [vmem:[#allocation2 + $0xe8] sm:$0xff]  }
 0x10e   :  { %v1155_v61 = vpop.f32.mrb[3].mxu1 }
 0x18d   :  { %v1135_v52 = vpop.f32.mrb[0].mxu0 }
 0x18e   :  { %v1515_v53 = vadd.f32 %v1135_v52, %v151_v50  ;;  %v218_v54 = vpop.f32.mrb[1].mxu0  ;;  %v1312_v50 = vld [vmem:[#allocation2 + $0xa0] sm:$0xff]   ;;  %v1314_v52 = vld [vmem:[#allocation2 + $0xb0] sm:$0xff]  }
 0x18f   :  { %v219_v55 = vadd.f32 %v218_v54, %v150_v51  ;;  %v1313_v51 = vld [vmem:[#allocation2 + $0xa8] sm:$0xff]   ;;  %v1316_v54 = vld [vmem:[#allocation2 + $0xc0] sm:$0xff]  }
 0x190   :  { %v231_v56 = vsel %vm227_vm14, %v1515_v53, 0.0 }
 0x191   :  { %232 = vadd.xlane.f32.xlu1 %v231_v56  ;;  %1160 = vmatprep.mubr.msk.f32.mxu0 %vm227_vm14, %v219_v55  ;;  %v228_v57 = vsel %vm227_vm14, %v219_v55, 0.0  ;;  %v1318_v56 = vld [vmem:[#allocation2 + $0xd0] sm:$0xff]  }
 0x192   :  { %229 = vadd.xlane.f32.xlu0 %v228_v57  ;;  %v1319_v57 = vld [vmem:[#allocation2 + $0xd8] sm:$0xff]  }
 0x196   :  { %250 = vadd.xlane.f32.xlu0 %v249_v36 }
 0x19a   :  { %253 = vadd.xlane.f32.xlu0 %v252_v38 }
 0x21e   :  { %v233_v4 = vpop.xlane.xlu1 %232 }
 0x21f   :  { %1324 = vrsqrt.f32 %v233_v4  ;;  %v230_v5 = vpop.xlane.xlu0 %229  ;;  %vm235_vm15 = vcmp.gt.f32.partialorder %v233_v4, 0.0 }
 0x220   :  { %1326 = vrsqrt.f32 %v230_v5  ;;  %vm234_vm0 = vcmp.gt.f32.partialorder %v230_v5, 0.0 }
 0x229   :  { %v1325_v6 = vpop.eup %1324 }
 0x22a   :  { %v1327_v7 = vpop.eup %1326  ;;  %v239_v8 = vsel %vm235_vm15, %v1325_v6, 0.0 }
 0x22b   :  { %v238_v9 = vsel %vm234_vm0, %v1327_v7, 0.0  ;;  %v421_v10 = vmul.f32 %v416_v60, %v239_v8  ;;  %v251_v60 = vpop.xlane.xlu0 %250  ;;  %v1322_v7 = vld [vmem:[#allocation2 + $0xf0] sm:$0xff]  }
 0x22c   :  { %v420_v11 = vmul.f32 %v413_v58, %v238_v9  ;;  %v1320_v58 = vld [vmem:[#allocation2 + $0xe0] sm:$0xff]   ;;  %v769_v63 = vmax.f32 %v251_v60, 1.0 }
 0x22e   :  { %v1269_v12 = vpack.c.bf16 %v421_v10, %v420_v11 }
 0x22f   :  { %v254_v61 = vpop.xlane.xlu0 %253 }
 0x230   :  { %1270 = vmatprep.subr.bf16.mxu0 %v1269_v12  ;;  %v770_v62 = vmax.f32 %v254_v61, 1.0 }
 0x231   :  { %1272 = vmatpush3.bf16.msra.mxu0 %v1269_v12 }
 0x232   :  { %1328 = vrcp.f32 %v770_v62 }
 0x233   :  { %1330 = vrcp.f32 %v769_v63 }
 0x234   :  { %1161 = vmatmul.mubr.msk.f32.vlgmr.msra.gmra.mrb[2].mxu0 %vm227_vm14, %v1515_v53 }
 0x235   :  { %1187 = vmatprep.mubr.msk.f32.mxu0 %vm227_vm14, %v219_v55  ;;  %v1317_v55 = vld [vmem:[#allocation2 + $0xc8] sm:$0xff]  }
 0x23c   :  { %v1329_v0 = vpop.eup %1328 }
 0x23d   :  { %v1331_v2 = vpop.eup %1330 }
 0x307   :  { %v1162_v16 = vpop.f32.mrb[2].mxu0 }
 0x308   :  { %v504_v17 = vmul.f32 %v1162_v16, %v239_v8  ;;  %v494_v19 = vpop.f32.mrb[3].mxu0 }
 0x309   :  { %v503_v20 = vmul.f32 %v494_v19, %v238_v9 }
 0x30a   :  { %v510_v21 = vadd.f32 %v1003_v15, %v504_v17 }
 0x30b   :  { %v509_v23 = vadd.f32 %v1003_v15, %v503_v20 }
 0x30c   :  { %v512_v24 = vmax.f32 %v510_v21, 0.0 }
 0x30d   :  { %v511_v25 = vmax.f32 %v509_v23, 0.0 }
 0x30f   :  { %v513_v26 = vpack.c.bf16 %v512_v24, %v511_v25 }
 0x311   :  { %1180 = vmatmul.mubr.bf16.vlgmr.msra.gmra.mrb[4].mxu1 %v513_v26 }
 0x312   :  { %1233 = vmatprep.mubr.msk.bf16.mxu1 %vm1362_vm1, %v1361_v22  ;;  %1218 = vmatpush3.bf16.msra.mxu1 %v1316_v54 }
 0x313   :  { %1219 = vmatprep.subr.bf16.mxu1 %v1361_v22 }
 0x316   :  { %1220 = vmatpush3.bf16.msra.mxu1 %v1317_v55 }
 0x317   :  { %1221 = vmatprep.subr.bf16.mxu1 %v1361_v22 }
 0x31a   :  { %1222 = vmatpush3.bf16.msra.mxu1 %v1318_v56 }
 0x31b   :  { %1223 = vmatprep.subr.bf16.mxu1 %v1361_v22 }
 0x31e   :  { %1224 = vmatpush3.bf16.msra.mxu1 %v1319_v57 }
 0x31f   :  { %1225 = vmatprep.subr.bf16.mxu1 %v1361_v22 }
 0x322   :  { %1226 = vmatpush3.bf16.msra.mxu1 %v1320_v58 }
 0x323   :  { %1227 = vmatprep.subr.bf16.mxu1 %v1361_v22 }
 0x326   :  { %1228 = vmatpush3.bf16.msra.mxu1 %v1321_v59 }
 0x327   :  { %1229 = vmatprep.subr.bf16.mxu1 %v1361_v22 }
 0x32a   :  { %1230 = vmatpush3.bf16.msra.mxu1 %v1322_v7 }
 0x32b   :  { %1231 = vmatprep.subr.bf16.mxu1 %v1361_v22 }
 0x3e4   :  { %v596_v27 = vpop.f32.mrb[4].mxu1 }
 0x3e5   :  { %v1181_v28 = vpop.f32.mrb[5].mxu1  ;;  %v603_v30 = vmul.f32 %v596_v27, %v238_v9 }
 0x3e6   :  { %v599_v29 = vpop.f32.mrb[6].mxu1 }
 0x3e7   :  { %v604_v31 = vmul.f32 %v599_v29, %v239_v8  ;;  %v1182_v32 = vpop.f32.mrb[7].mxu1 }
 0x3e9   :  { %v1273_v33 = vpack.c.bf16 %v604_v31, %v603_v30 }
 0x3eb   :  { %1274 = vmatprep.subr.bf16.mxu0 %v1273_v33 }
 0x3ec   :  { %1276 = vmatpush3.bf16.msra.mxu0 %v1273_v33 }
 0x3ef   :  { %1188 = vmatmul.mubr.msk.f32.vlgmr.msra.gmra.mrb[4].mxu0 %vm227_vm14, %v1515_v53  ;;  %v1315_v53 = vld [vmem:[#allocation2 + $0xb8] sm:$0xff]  }
 0x3f0   :  { %1194 = vmatprep.mubr.msk.f32.mxu0 %vm227_vm14, %v247_v35 }
 0x4c2   :  { %v1189_v40 = vpop.f32.mrb[4].mxu0 }
 0x4c3   :  { %v681_v18 = vmul.f32 %v1189_v40, %v239_v8  ;;  %v671_v41 = vpop.f32.mrb[5].mxu0  ;;  %v1323_v8 = vld [vmem:[#allocation2 + $0xf8] sm:$0xff]  }
 0x4c4   :  { %v680_v42 = vmul.f32 %v671_v41, %v238_v9  ;;  %1232 = vmatpush3.bf16.msra.mxu1 %v1323_v8  ;;  %v1017_v9 = vld [vmem:[%s1587_s5 + $0x2] ss:$0 sm:$0xff] }
 0x4c5   :  { %v687_v43 = vadd.f32 %v1014_v39, %v681_v18 }
 0x4c6   :  { %v686_v44 = vadd.f32 %v1014_v39, %v680_v42 }
 0x4c8   :  { %v1277_v45 = vpack.c.bf16 %v687_v43, %v686_v44 }
 0x4ca   :  { %1278 = vmatprep.subr.bf16.mxu0 %v1277_v45 }
 0x4cb   :  { %1280 = vmatpush3.bf16.msra.mxu0 %v1277_v45 }
 0x4cc   :  { %1197 = vmatprep.subr.bf16.mxu0 %v1361_v22 }
 0x4ce   :  { %1195 = vmatmul.mubr.msk.f32.vlgmr.msra.gmra.mrb[6].mxu0 %vm227_vm14, %v248_v37 }
 0x4cf   :  { %1198 = vmatpush3.bf16.msra.mxu0 %v1308_v46  ;;  %1213 = vmatprep.mubr.msk.bf16.mxu0 %vm1362_vm1, %v1361_v22 }
 0x4d0   :  { %1199 = vmatprep.subr.bf16.mxu0 %v1361_v22 }
 0x4d3   :  { %1200 = vmatpush3.bf16.msra.mxu0 %v1309_v47 }
 0x4d4   :  { %1201 = vmatprep.subr.bf16.mxu0 %v1361_v22 }
 0x4d7   :  { %1202 = vmatpush3.bf16.msra.mxu0 %v1310_v48 }
 0x4d8   :  { %1203 = vmatprep.subr.bf16.mxu0 %v1361_v22 }
 0x4db   :  { %1204 = vmatpush3.bf16.msra.mxu0 %v1311_v49 }
 0x4dc   :  { %1205 = vmatprep.subr.bf16.mxu0 %v1361_v22 }
 0x4df   :  { %1206 = vmatpush3.bf16.msra.mxu0 %v1312_v50 }
 0x4e0   :  { %1207 = vmatprep.subr.bf16.mxu0 %v1361_v22 }
 0x4e3   :  { %1208 = vmatpush3.bf16.msra.mxu0 %v1313_v51 }
 0x4e4   :  { %1209 = vmatprep.subr.bf16.mxu0 %v1361_v22 }
 0x4e7   :  { %1210 = vmatpush3.bf16.msra.mxu0 %v1314_v52 }
 0x4e8   :  { %1211 = vmatprep.subr.bf16.mxu0 %v1361_v22  ;;  %v1026_v22 = vld [vmem:[%s1587_s5 + $0x3] ss:$0 sm:$0xff] }
 0x4eb   :  { %1212 = vmatpush3.bf16.msra.mxu0 %v1315_v53 }
 0x5a1   :  { %v1196_v1 = vpop.f32.mrb[6].mxu0 }
 0x5a2   :  { %v774_v3 = vmul.f32 %v1329_v0, %v1196_v1  ;;  %v760_v4 = vpop.f32.mrb[7].mxu0 }
 0x5a3   :  { %v772_v5 = vmul.f32 %v1331_v2, %v760_v4 }
 0x5a5   :  { %v775_v6 = vpack.c.bf16 %v774_v3, %v772_v5 }
 0x5a7   :  { %1214 = vmatmul.mubr.bf16.vlgmr.msra.gmra.mrb[8].mxu0 %v775_v6 }
 0x67a   :  { %v862_v10 = vpop.f32.mrb[8].mxu0 }
 0x67b   :  { %v863_v11 = vadd.f32 %v1017_v9, %v862_v10  ;;  %v1215_v12 = vpop.f32.mrb[9].mxu0 }
 0x67c   :  { %v865_v13 = vpop.f32.mrb[10].mxu0 }
 0x67d   :  { %v866_v14 = vadd.f32 %v1017_v9, %v865_v13  ;;  %v1216_v15 = vpop.f32.mrb[11].mxu0  ;;  %v869_v16 = vmax.f32 %v863_v11, 0.0 }
 0x67f   :  { %v870_v17 = vmax.f32 %v866_v14, 0.0 }
 0x681   :  { %v871_v19 = vpack.c.bf16 %v870_v17, %v869_v16 }
 0x683   :  { %1234 = vmatmul.mubr.bf16.vlgmr.msra.gmra.mrb[8].mxu1 %v871_v19 }
 0x756   :  { %v958_v20 = vpop.f32.mrb[8].mxu1 }
 0x757   :  { %v959_v21 = vadd.f32 %v1026_v22, %v958_v20  ;;  %v1235_v23 = vpop.f32.mrb[9].mxu1 }
 0x758   :  { %v961_v24 = vpop.f32.mrb[10].mxu1 }
 0x759   :  { %965 = vst [vmem:[%s1588_s6] sm:$0xff] %v959_v21  ;;  %v962_v25 = vadd.f32 %v1026_v22, %v961_v24  ;;  %v1236_v26 = vpop.f32.mrb[11].mxu1 }
 0x75b   :  { %966 = vst [vmem:[%s1588_s6 + $0x8] sm:$0xff] %v962_v25 }
 0x75c   :  { %971 = vsyncpa [#allocation3], 1 }

</bundles_post_ra>
